<compile_context>
chip_gen: v6e
topology: v6e:2x2x1
jax: 0.10.0
libtpu: 0.0.40
codegen_flags: <defaults>
</compile_context>

<pallas_src>
import numpy as np
import jax
import jax.numpy as jnp
from jax import lax
from jax.experimental import pallas as pl
from jax.experimental.pallas import tpu as pltpu


def _round_up(x, m):
    return ((x + m - 1) // m) * m


def _make_gain_kernel(class_index, targeted):
    sign = -1.0 if targeted else 1.0

    def kernel(bounds_ref, x_ref, out_ref):
        t = pl.program_id(0)
        tile_rows = x_ref.shape[0]
        n_images = out_ref.shape[1]

        # Init the resident accumulator on the first tile.
        @pl.when(t == 0)
        def _init():
            out_ref[...] = jnp.zeros_like(out_ref)

        # Numerically-stable per-row cross-entropy vs. the constant target
        # class.  Upcast to f32 only inside the kernel (HBM transfer stays in
        # the source dtype).
        x = x_ref[...].astype(jnp.float32)                         # (TR, C)
        m = jnp.max(x, axis=-1, keepdims=True)                     # (TR, 1)
        lse = m + jnp.log(jnp.sum(jnp.exp(x - m), axis=-1, keepdims=True))
        tgt = x[:, class_index:class_index + 1]                    # (TR, 1)
        per_row = lse - tgt                                        # (TR, 1)

        # Segmented (per-image) sum: image j owns global rows
        # [starts[j], ends[j]).  Padded rows past `total` match no image.
        starts = bounds_ref[0:1, :]                                # (1, NI)
        ends = bounds_ref[1:2, :]                                  # (1, NI)
        rows = t * tile_rows + lax.broadcasted_iota(
            jnp.int32, (tile_rows, n_images), 0)                   # (TR, NI)
        member = (rows >= starts) & (rows < ends)                  # (TR, NI)
        partial = jnp.sum(jnp.where(member, per_row, 0.0),
                          axis=0, keepdims=True)                   # (1, NI)

        out_ref[...] += partial

        # Normalize to a mean and apply the sign on the last tile.
        @pl.when(t == pl.num_programs(0) - 1)
        def _finalize():
            counts = (ends - starts).astype(jnp.float32)           # (1, NI)
            out_ref[...] = sign * out_ref[...] / counts

    return kernel


def roi_head_target_class_gain(roi_heads_class_logits, proposals,
                               class_index=0, targeted=True, tile_rows=None):
    """JAX/Pallas equivalent of RoIHeadTargetClass.forward."""
    boxes_per_image = [int(p.shape[0]) for p in proposals]
    total, n_classes = roi_heads_class_logits.shape
    assert sum(boxes_per_image) == total
    assert 0 <= class_index < n_classes, "class_index out of range"
    n_images = len(boxes_per_image)
    assert n_images >= 1

    # Static per-image row ranges in the flat logits array.
    ends_np = np.cumsum(boxes_per_image).astype(np.int32)
    starts_np = np.concatenate([[0], ends_np[:-1]]).astype(np.int32)
    bounds = jnp.asarray(np.stack([starts_np, ends_np]), dtype=jnp.int32)

    # Tile the row axis.  Size so one lane-padded block is <= ~512 KiB
    # (double-buffered by the pipeline -> ~1 MiB of input VMEM, safe on v5e).
    itemsize = jnp.dtype(roi_heads_class_logits.dtype).itemsize
    if tile_rows is None:
        lane_c = max(_round_up(n_classes, 128), 128)
        tile_rows = max(8, ((512 * 1024) // (lane_c * itemsize)) // 8 * 8)
        tile_rows = min(tile_rows, 2048)
    tile_rows = max(8, _round_up(int(tile_rows), 8))
    tile_rows = min(tile_rows, _round_up(total, 8))
    total_p = _round_up(max(total, 1), tile_rows)
    n_tiles = total_p // tile_rows

    # Single contiguous pad of the row axis (source dtype preserved).
    x = roi_heads_class_logits
    if total_p != total:
        x = jnp.pad(x, ((0, total_p - total), (0, 0)))

    kernel = _make_gain_kernel(class_index, targeted)

    out = pl.pallas_call(
        kernel,
        out_shape=jax.ShapeDtypeStruct((1, n_images), jnp.float32),
        grid=(n_tiles,),
        in_specs=[
            # Per-image row bounds: tiny, resident for the whole grid.
            pl.BlockSpec((2, n_images), lambda t: (0, 0)),
            # Streamed row tiles of the flat logits.
            pl.BlockSpec((tile_rows, n_classes), lambda t: (t, 0)),
        ],
        # Accumulator output: same block every step (revisited), finalized at
        # the last tile.
        out_specs=pl.BlockSpec((1, n_images), lambda t: (0, 0)),
        compiler_params=pltpu.CompilerParams(
            dimension_semantics=("arbitrary",)),
    )(bounds, x)
    return out[0]


def _reference_gain(logits, proposals, class_index=0, targeted=True):
    """Pure-JAX reference mirroring the PyTorch loop."""
    gains = []
    off = 0
    for p in proposals:
        b = int(p.shape[0])
        batch_logits = logits[off:off + b]
        log_probs = jax.nn.log_softmax(batch_logits.astype(jnp.float32), axis=-1)
        ce = -jnp.mean(log_probs[:, class_index])
        gains.append(-ce if targeted else ce)
        off += b
    return jnp.stack(gains)


if __name__ == "__main__":
    key = jax.random.PRNGKey(0)

    # ---- Case 1: tiny shapes (2 images, 8 + 5 proposals, 16 classes) ----
    k_logits, k_p0, k_p1, k2 = jax.random.split(key, 4)
    boxes_per_image = [8, 5]
    n_classes = 16
    total = sum(boxes_per_image)

    roi_heads_class_logits = jax.random.normal(
        k_logits, (total, n_classes), dtype=jnp.float32)
    proposals = [
        jax.random.uniform(k_p0, (boxes_per_image[0], 4), dtype=jnp.float32) * 100.0,
        jax.random.uniform(k_p1, (boxes_per_image[1], 4), dtype=jnp.float32) * 100.0,
    ]

    gains = roi_head_target_class_gain(roi_heads_class_logits, proposals,
                                       class_index=0, targeted=True)
    gains = jax.block_until_ready(gains)
    ref = jax.block_until_ready(
        _reference_gain(roi_heads_class_logits, proposals,
                        class_index=0, targeted=True))
    np.testing.assert_allclose(np.asarray(gains), np.asarray(ref),
                               rtol=1e-5, atol=2e-5)

    # ---- Case 2: multi-tile accumulation path (3 images, forced small tile) ----
    k_logits2, k_q0, k_q1, k_q2 = jax.random.split(k2, 4)
    boxes2 = [150, 70, 37]
    total2 = sum(boxes2)
    logits2 = jax.random.normal(k_logits2, (total2, n_classes), dtype=jnp.float32)
    proposals2 = [
        jax.random.uniform(k_q0, (boxes2[0], 4), dtype=jnp.float32) * 100.0,
        jax.random.uniform(k_q1, (boxes2[1], 4), dtype=jnp.float32) * 100.0,
        jax.random.uniform(k_q2, (boxes2[2], 4), dtype=jnp.float32) * 100.0,
    ]
    gains2 = jax.block_until_ready(
        roi_head_target_class_gain(logits2, proposals2, class_index=0,
                                   targeted=True, tile_rows=64))
    ref2 = jax.block_until_ready(
        _reference_gain(logits2, proposals2, class_index=0, targeted=True))
    np.testing.assert_allclose(np.asarray(gains2), np.asarray(ref2),
                               rtol=1e-5, atol=2e-5)

    print("KERNEL_OK")
</pallas_src>

<mosaic_0001>
module attributes {stable_mosaic.version = 11 : i64} {
  func.func @kernel(%arg0: i32, %arg1: memref<2x2xi32, #tpu.memory_space<vmem>>, %arg2: memref<16x16xf32, #tpu.memory_space<vmem>>, %arg3: memref<1x2xf32, #tpu.memory_space<vmem>>) attributes {dimension_semantics = [#tpu.dimension_semantics<arbitrary>], iteration_bounds = array<i64: 1>, scalar_prefetch = 0 : i64, scratch_operands = 0 : i64, tpu.core_type = #tpu.core_type<tc>, window_params = [{pipeline_mode = #tpu.pipeline_mode<synchronous>, transform_indices = @transform_0, window_bounds = array<i64: 2, 2>}, {transform_indices = @transform_1, window_bounds = array<i64: 16, 16>}, {pipeline_mode = #tpu.pipeline_mode<synchronous>, transform_indices = @transform_2, window_bounds = array<i64: 1, 2>}]} {
    %c0_i32 = arith.constant 0 : i32
    %0 = arith.cmpi eq, %arg0, %c0_i32 : i32
    %1 = arith.extui %0 : i1 to i32
    %c0_i32_0 = arith.constant 0 : i32
    %2 = arith.cmpi ne, %1, %c0_i32_0 : i32
    scf.if %2 {
      %cst_14 = arith.constant 0.000000e+00 : f32
      %38 = vector.broadcast %cst_14 : f32 to vector<1x2xf32>
      %c0_15 = arith.constant 0 : index
      %c0_16 = arith.constant 0 : index
      %39 = vector.load %arg3[%c0_15, %c0_16] : memref<1x2xf32, #tpu.memory_space<vmem>>, vector<1x2xf32>
      tpu.vector_store %arg3[%c0_15, %c0_16], %38 {strides = array<i32>} : memref<1x2xf32, #tpu.memory_space<vmem>>, vector<1x2xf32>,
    } else {
    }
    %c0 = arith.constant 0 : index
    %c0_1 = arith.constant 0 : index
    %3 = vector.load %arg2[%c0, %c0_1] : memref<16x16xf32, #tpu.memory_space<vmem>>, vector<16x16xf32>
    %cst = arith.constant dense<0xFF800000> : vector<16xf32>
    %4 = vector.multi_reduction <maximumf>, %3, %cst [1] : vector<16x16xf32> to vector<16xf32>
    %5 = vector.shape_cast %4 : vector<16xf32> to vector<16x1xf32>
    %6 = vector.broadcast %5 : vector<16x1xf32> to vector<16x16xf32>
    %7 = arith.subf %3, %6 : vector<16x16xf32>
    %8 = math.exp %7 : vector<16x16xf32>
    %cst_2 = arith.constant dense<0.000000e+00> : vector<16xf32>
    %9 = vector.multi_reduction <add>, %8, %cst_2 [1] : vector<16x16xf32> to vector<16xf32>
    %10 = vector.shape_cast %9 : vector<16xf32> to vector<16x1xf32>
    %11 = math.log %10 : vector<16x1xf32>
    %12 = arith.addf %5, %11 : vector<16x1xf32>
    %13 = vector.extract_strided_slice %3 {offsets = [0, 0], sizes = [16, 1], strides = [1, 1]} : vector<16x16xf32> to vector<16x1xf32>
    %14 = arith.subf %12, %13 : vector<16x1xf32>
    %c0_3 = arith.constant 0 : index
    %c0_4 = arith.constant 0 : index
    %15 = vector.load %arg1[%c0_3, %c0_4] : memref<2x2xi32, #tpu.memory_space<vmem>>, vector<1x2xi32>
    %c1 = arith.constant 1 : index
    %c0_5 = arith.constant 0 : index
    %16 = vector.load %arg1[%c1, %c0_5] : memref<2x2xi32, #tpu.memory_space<vmem>>, vector<1x2xi32>
    %c16_i32 = arith.constant 16 : i32
    %17 = arith.muli %arg0, %c16_i32 : i32
    %18 = tpu.iota {dimensions = array<i32: 0>} : vector<16x2xi32>
    %19 = vector.broadcast %17 : i32 to vector<16x2xi32>
    %20 = arith.addi %19, %18 : vector<16x2xi32>
    %21 = vector.broadcast %15 : vector<1x2xi32> to vector<16x2xi32>
    %22 = arith.cmpi sge, %20, %21 : vector<16x2xi32>
    %23 = vector.broadcast %16 : vector<1x2xi32> to vector<16x2xi32>
    %24 = arith.cmpi slt, %20, %23 : vector<16x2xi32>
    %25 = arith.andi %22, %24 : vector<16x2xi1>
    %cst_6 = arith.constant 0.000000e+00 : f32
    %26 = vector.shape_cast %14 : vector<16x1xf32> to vector<16x1xf32>
    %27 = vector.broadcast %26 : vector<16x1xf32> to vector<16x2xf32>
    %28 = vector.broadcast %cst_6 : f32 to vector<16x2xf32>
    %29 = arith.select %25, %27, %28 : vector<16x2xi1>, vector<16x2xf32>
    %cst_7 = arith.constant dense<0.000000e+00> : vector<2xf32>
    %30 = vector.multi_reduction <add>, %29, %cst_7 [0] : vector<16x2xf32> to vector<2xf32>
    %31 = vector.shape_cast %30 : vector<2xf32> to vector<1x2xf32>
    %c0_8 = arith.constant 0 : index
    %c0_9 = arith.constant 0 : index
    %32 = vector.load %arg3[%c0_8, %c0_9] : memref<1x2xf32, #tpu.memory_space<vmem>>, vector<1x2xf32>
    %33 = arith.addf %32, %31 : vector<1x2xf32>
    %c0_10 = arith.constant 0 : index
    %c0_11 = arith.constant 0 : index
    %34 = vector.load %arg3[%c0_10, %c0_11] : memref<1x2xf32, #tpu.memory_space<vmem>>, vector<1x2xf32>
    tpu.vector_store %arg3[%c0_10, %c0_11], %33 {strides = array<i32>} : memref<1x2xf32, #tpu.memory_space<vmem>>, vector<1x2xf32>,
    %c0_i32_12 = arith.constant 0 : i32
    %35 = arith.cmpi eq, %arg0, %c0_i32_12 : i32
    %36 = arith.extui %35 : i1 to i32
    %c0_i32_13 = arith.constant 0 : i32
    %37 = arith.cmpi ne, %36, %c0_i32_13 : i32
    scf.if %37 {
      %38 = arith.subi %16, %15 : vector<1x2xi32>
      %39 = arith.sitofp %38 : vector<1x2xi32> to vector<1x2xf32>
      %c0_14 = arith.constant 0 : index
      %c0_15 = arith.constant 0 : index
      %40 = vector.load %arg3[%c0_14, %c0_15] : memref<1x2xf32, #tpu.memory_space<vmem>>, vector<1x2xf32>
      %cst_16 = arith.constant -1.000000e+00 : f32
      %41 = vector.broadcast %cst_16 : f32 to vector<1x2xf32>
      %42 = arith.mulf %41, %40 : vector<1x2xf32>
      %43 = arith.divf %42, %39 : vector<1x2xf32>
      %c0_17 = arith.constant 0 : index
      %c0_18 = arith.constant 0 : index
      %44 = vector.load %arg3[%c0_17, %c0_18] : memref<1x2xf32, #tpu.memory_space<vmem>>, vector<1x2xf32>
      tpu.vector_store %arg3[%c0_17, %c0_18], %43 {strides = array<i32>} : memref<1x2xf32, #tpu.memory_space<vmem>>, vector<1x2xf32>,
    } else {
    }
    return
  }
  func.func @transform_0(%arg0: i32) -> (i32, i32) {
    %c0_i32 = arith.constant 0 : i32
    %c0_i32_0 = arith.constant 0 : i32
    %c0_i32_1 = arith.constant 0 : i32
    return %c0_i32, %c0_i32_0 : i32, i32
  }
  func.func @transform_1(%arg0: i32) -> (i32, i32) {
    %c0_i32 = arith.constant 0 : i32
    %c0_i32_0 = arith.constant 0 : i32
    return %arg0, %c0_i32 : i32, i32
  }
  func.func @transform_2(%arg0: i32) -> (i32, i32) {
    %c0_i32 = arith.constant 0 : i32
    %c0_i32_0 = arith.constant 0 : i32
    %c0_i32_1 = arith.constant 0 : i32
    return %c0_i32, %c0_i32_0 : i32, i32
  }
}

</mosaic_0001>

<bundles_post_ra>
// kernel: tpu_custom_call.1
= control target key start
LH: loop header
LB: loop body
LE: loop exit
PB: predicated region body
PF: predicated region fallthrough
CT: control target
= control target key end

     0   :  { %7 = vsyncpa [#allocation3], 0  ;;  %s271_s0 = inlined_call_operand.hbm [shape: s32[2,2], index: 0, kind: input, shape index: {}]   ;;  %s272_s1 = inlined_call_operand.hbm [shape: f32[16,16], index: 1, kind: input, shape index: {}]   ;;  %s273_s2 = inlined_call_operand.hbm [shape: f32[1,2], index: 2, kind: output, shape index: {}]  }
   0x1   :  { %8 = vsyncpa [#allocation6], 0 }
   0x2   :  { %9 = vsyncpa [#allocation4], 0  ;;  %s233_s9 = smov [#allocation2]   ;;  %s234_s11 = smov [#allocation5]  }
   0x3   :  { %s16_s10 = sshll.u32 %s233_s9, 4  ;;  %s25_s12 = sshll.u32 %s234_s11, 4  ;;  %s17_s10 = int_to_ptr.vmem [resolvable:$true] %s16_s10  ;;  %s26_s12 = int_to_ptr.vmem [resolvable:$true] %s25_s12 }
   0x4   :  { %s175_s13 = scalar_lea.vmem %s17_s10, 32  ;;  %p180_p1 = scmp.lt.s32.totalorder %s17_s10, %s17_s10 }
   0x5   :  { %p176_p0 = scmp.ne.s32.totalorder %s17_s10, %s175_s13  ;;  %p181_p2 = scmp.lt.s32.totalorder %s175_s13, %s175_s13 }
   0x7   :  { %p182_p3 = por %p181_p2, %p180_p1 }
   0x9   :  { %p183_p4 = pnand %p182_p3, %p176_p0 }
   0xb   :  { %186 = shalt.err (!%p183_p4)
}
   0xc   :  { %19 = dma.hbm_to_vmem [thread:$0]  %s271_s0, 32, %s17_s10, [#allocation3]  }
   0xd   :  { %s195_s16 = scalar_lea.vmem %s26_s12, 256  ;;  %p200_p6 = scmp.lt.s32.totalorder %s26_s12, %s26_s12 }
   0xe   :  { %p196_p5 = scmp.ne.s32.totalorder %s26_s12, %s195_s16  ;;  %p201_p7 = scmp.lt.s32.totalorder %s195_s16, %s195_s16 }
  0x10   :  { %p202_p8 = por %p201_p7, %p200_p6 }
  0x12   :  { %p203_p9 = pnand %p202_p8, %p196_p5 }
  0x14   :  { %206 = shalt.err (!%p203_p9)
}
  0x15   :  { %s235_s17 = smov 128   ;;  %s236_s18 = smov 8  }
  0x16   :  { %31 = dma.hbm_to_vmem [thread:$0]  %s272_s1, 256, %s26_s12, [#allocation6], %s235_s17, %s235_s17, %s236_s18  }
  0x17   :  { %227 = dma.done.wait [#allocation3], 32  }
  0x18   :  { %228 = vsyncadd [#allocation3], 4294967264 }
  0x19   :  { %229 = dma.done.wait [#allocation6], 256  }
  0x1a   :  { %230 = vsyncadd [#allocation6], 4294967040  ;;  %vm46_vm0 = vcmask 130048   ;;  %v44_v0 = vld [vmem:[#allocation5] sm:$0xff]  ;;  %v45_v1 = vld [vmem:[#allocation5 + $0x8] sm:$0xff]  ;;  %v237_v14 = vmov 0   ;;  %v76_v26 = vlaneseq }
  0x1b   :  { %v47_v2 = vsel %vm46_vm0, %v44_v0, -inf  ;;  %v50_v3 = vsel %vm46_vm0, %v45_v1, -inf  ;;  %155 = vset.pattern.permute.xlu0 %v237_v14  ;;  %156 = vset.pattern.permute.xlu1 %v237_v14  ;;  %vm42_vm1 = vcmask 8192   ;;  %v238_v23 = vmov 0.0   ;;  %v73_v29 = vld [vmem:[#allocation2] sm:$0x1] }
  0x1c   :  { %48 = vmax.xlane.f32.xlu0 %v47_v2  ;;  %43 = vst.msk [vmem:[#allocation7] sm:$0x1] %vm42_vm1, %v238_v23  ;;  %v77_v27 = vshrl.u32 %v76_v26, 7  ;;  %v74_v30 = vld [vmem:[#allocation2 + $0x1] sm:$0x1]  ;;  %vm108_vm8 = vcmask 15360  }
  0x1d   :  { %v125_v41 = vsub.s32 %v74_v30, %v73_v29  ;;  %s239_s0 = smov [#allocation7]  }
  0x1e   :  { %v84_v28 = vsub.s32 0, %v77_v27  ;;  %v78_v33 = vadd.s32 8, %v77_v27  ;;  %s138_s1 = sshll.u32 %s239_s0, 4  ;;  %s139_s1 = int_to_ptr.vmem [resolvable:$true] %s138_s1 }
  0x1f   :  { %v126_v44 = vcvt.s32.f32 %v125_v41  ;;  %s207_s21 = scalar_lea.vmem %s139_s1, 16  ;;  %s211_s22 = scalar_lea.vmem %s139_s1, 32 }
  0x20   :  { %51 = vmax.xlane.f32.xlu0 %v50_v3  ;;  %v85_v31 = vrot.slane %v73_v29, %v84_v28  ;;  %v91_v32 = vrot.slane %v74_v30, %v84_v28  ;;  %p208_p10 = scmp.ne.s32.totalorder %s139_s1, %s207_s21  ;;  %p212_p11 = scmp.lt.s32.totalorder %s139_s1, %s139_s1 }
  0x21   :  { %p213_p12 = scmp.lt.s32.totalorder %s211_s22, %s207_s21 }
  0x22   :  { %vm86_vm2 = vcmp.ge.s32.totalorder %v77_v27, %v85_v31  ;;  %vm92_vm3 = vcmp.lt.s32.totalorder %v77_v27, %v91_v32  ;;  %vm87_vm4 = vcmp.ge.s32.totalorder %v78_v33, %v85_v31  ;;  %vm93_vm5 = vcmp.lt.s32.totalorder %v78_v33, %v91_v32 }
  0x23   :  { %vm94_vm6 = vmand %vm86_vm2, %vm92_vm3  ;;  %v118_v48 = vld [vmem:[#allocation7] sm:$0x1]  ;;  %p214_p13 = por %p213_p12, %p212_p11 }
  0x24   :  { %vm95_vm7 = vmand %vm87_vm4, %vm93_vm5 }
  0x25   :  { %p215_p0 = pnand %p214_p13, %p208_p10 }
  0xa5   :  { %v49_v4 = vpop.xlane.xlu0 %48 }
  0xa6   :  { %v53_v5 = vsub.f32 %v44_v0, %v49_v4 }
  0xa8   :  { %v55_v6 = vmul.f32 1.442695, %v53_v5 }
  0xa9   :  { %v52_v7 = vpop.xlane.xlu0 %51 }
  0xaa   :  { %157 = vpow2.f32 %v55_v6  ;;  %v54_v8 = vsub.f32 %v45_v1, %v52_v7 }
  0xac   :  { %v57_v9 = vmul.f32 1.442695, %v54_v8 }
  0xae   :  { %159 = vpow2.f32 %v57_v9 }
  0xb7   :  { %v158_v10 = vpop.eup %157 }
  0xb8   :  { %v59_v11 = vsel %vm46_vm0, %v158_v10, 0.0 }
  0xb9   :  { %60 = vadd.xlane.f32.xlu1 %v59_v11 }
  0xbb   :  { %v160_v12 = vpop.eup %159 }
  0xbc   :  { %v62_v13 = vsel %vm46_vm0, %v160_v12, 0.0 }
  0xbd   :  { %63 = vadd.xlane.f32.xlu1 %v62_v13 }
 0x142   :  { %v61_v15 = vpop.xlane.xlu1 %60 }
 0x143   :  { %161 = vlog2.f32 %v61_v15 }
 0x146   :  { %v64_v16 = vpop.xlane.xlu1 %63 }
 0x147   :  { %163 = vlog2.f32 %v64_v16 }
 0x148   :  { %165 = vrcp.f32 %v126_v44 }
 0x150   :  { %v162_v17 = vpop.eup %161 }
 0x151   :  { %v66_v18 = vmul.f32 0.6931472, %v162_v17 }
 0x153   :  { %v69_v19 = vadd.f32 %v66_v18, %v49_v4 }
 0x154   :  { %v164_v20 = vpop.eup %163 }
 0x155   :  { %v68_v21 = vmul.f32 0.6931472, %v164_v20  ;;  %v71_v22 = vsub.f32 %v69_v19, %v44_v0  ;;  %v166_v51 = vpop.eup %165 }
 0x157   :  { %98 = vperm.xlu0 %155, %v71_v22   ;;  %v70_v24 = vadd.f32 %v68_v21, %v52_v7 }
 0x159   :  { %v72_v25 = vsub.f32 %v70_v24, %v45_v1 }
 0x15b   :  { %103 = vperm.xlu1 %156, %v72_v25  }
 0x1d2   :  { %v99_v34 = vpop.permute.xlu0 %98 }
 0x1d3   :  { %v106_v35 = vsel %vm94_vm6, %v99_v34, 0.0 }
 0x1d4   :  { %v109_v38 = vsel %vm108_vm8, %v106_v35, 0.0 }
 0x1d6   :  { %v104_v36 = vpop.permute.xlu1 %103 }
 0x1d7   :  { %v107_v37 = vsel %vm95_vm7, %v104_v36, 0.0 }
 0x1d8   :  { %v110_v39 = vsel %vm108_vm8, %v107_v37, 0.0 }
 0x1d9   :  { %v111_v40 = vadd.f32 %v110_v39, %v109_v38 }
 0x1db   :  { %v112_v42 = vrot.slane %v111_v40, 4 }
 0x1dd   :  { %v113_v43 = vadd.f32 %v112_v42, %v111_v40 }
 0x1df   :  { %v114_v45 = vrot.slane %v113_v43, 2 }
 0x1e1   :  { %v115_v46 = vadd.f32 %v114_v45, %v113_v43 }
 0x1e3   :  { %v116_v47 = vrot.slane %v115_v46, 1 }
 0x1e5   :  { %v117_v49 = vadd.f32 %v116_v47, %v115_v46 }
 0x1e7   :  { %v119_v50 = vadd.f32 %v118_v48, %v117_v49 }
 0x1e9   :  { %121 = vst.msk [vmem:[#allocation7] sm:$0x1] %vm42_vm1, %v119_v50 }
 0x1f0   :  { %v127_v52 = vld [vmem:[#allocation7] sm:$0x1] }
 0x1f1   :  { %v128_v53 = vmul.f32 -1.0, %v127_v52 }
 0x1f3   :  { %v130_v54 = vmul.f32 %v166_v51, %v128_v53 }
 0x1f5   :  { %131 = vst.msk [vmem:[#allocation7] sm:$0x1] %vm42_vm1, %v130_v54 }
 0x1f6   :  { %218 = shalt.err (!%p215_p0)
}
 0x1f7   :  { %141 = dma.vmem_to_hbm [thread:$0]  %s139_s1, 16, %s273_s2, [#allocation4]  }
 0x1f8   :  { %231 = dma.done.wait [#allocation4], 16  }
 0x1f9   :  { %232 = vsyncadd [#allocation4], 4294967280 }
 0x1fa   :  { %145 = vsyncpa [#allocation3], 1 }
 0x1fb   :  { %146 = vsyncpa [#allocation6], 1 }
 0x1fc   :  { %147 = vsyncpa [#allocation4], 1 }

</bundles_post_ra>
